<compile_context>
chip_gen: v7x
topology: tpu7x:2x2x1
jax: 0.10.0
libtpu: 0.0.40
codegen_flags: <defaults>
</compile_context>

<pallas_src>
import jax
import jax.numpy as jnp
from jax.experimental import pallas as pl
from jax.experimental.pallas import tpu as pltpu


def _round_up(a: int, b: int) -> int:
    return ((a + b - 1) // b) * b


def _chip_info():
    """Best-effort chip query: (is_v7x, has_bf16_vpu, vmem_capacity_bytes)."""
    kind = ""
    try:
        kind = jax.devices()[0].device_kind.lower()
    except Exception:
        pass
    is_v7 = "v7" in kind
    has_bf16_vpu = ("v6" in kind) or is_v7          # v5e and older: no bf16 VPU
    try:
        vmem_cap = int(pltpu.get_tpu_info().vmem_capacity_bytes)
    except Exception:
        vmem_cap = (64 if is_v7 else 128) * 1024 * 1024
    return is_v7, has_bf16_vpu, vmem_cap


def _vmem_need(tm, e_pad, ep_b, mm_b, out_b):
    """Accurate-ish VMEM accounting for one grid step (review feedback)."""
    x_bufs = 2 * tm * 4                       # (tm, 1) f32 input, double-buffered
    out_bufs = 2 * tm * e_pad * out_b         # (tm, E_pad) output, double-buffered
    big_w = 2 * e_pad * e_pad * mm_b          # resident w1, w2
    vecs = 4 * e_pad * ep_b                   # w0, b0, b1, b2
    acts = tm * e_pad * (ep_b + 4 + mm_b)     # live h (ep), f32 dot result, mm LHS
    return x_bufs + out_bufs + big_w + vecs + acts


def _make_kernel(ep_dtype, mm_dtype, f32_parity):
    """Kernel factory; ep_dtype = epilogue/elementwise dtype, mm_dtype = MXU input dtype."""
    prec = jax.lax.Precision.HIGHEST if f32_parity else None

    def kernel(alpha_ref,               # SMEM (3,)   PReLU scalars (f32)
               x_ref,                   # VMEM (TM,1) f32, pipelined
               w0_ref, b0_ref,          # VMEM (1, Ep)  ep_dtype, resident
               w1_ref, b1_ref,          # VMEM (Ep,Ep) mm_dtype / (1,Ep) ep_dtype
               w2_ref, b2_ref,          # VMEM (Ep,Ep) mm_dtype / (1,Ep) ep_dtype
               o_ref):                  # VMEM (TM, Ep) out dtype
        a0 = alpha_ref[0].astype(ep_dtype)
        a1 = alpha_ref[1].astype(ep_dtype)
        a2 = alpha_ref[2].astype(ep_dtype)

        # Layer 0: Linear(1, E) is a broadcasted scale + bias (VPU only),
        # computed directly in ep_dtype so it is already the LHS for layer 1.
        h = x_ref[...].astype(ep_dtype) * w0_ref[...] + b0_ref[...]   # (TM,1)*(1,Ep)
        h = jnp.where(h >= 0, h, a0 * h)                              # PReLU

        # Layer 1: MXU matmul with f32 accumulation; epilogue in ep_dtype.
        h = jnp.dot(h.astype(mm_dtype), w1_ref[...],
                    preferred_element_type=jnp.float32,
                    precision=prec).astype(ep_dtype) + b1_ref[...]
        h = jnp.where(h >= 0, h, a1 * h)

        # Layer 2: same structure.
        h = jnp.dot(h.astype(mm_dtype), w2_ref[...],
                    preferred_element_type=jnp.float32,
                    precision=prec).astype(ep_dtype) + b2_ref[...]
        h = jnp.where(h >= 0, h, a2 * h)

        o_ref[...] = h.astype(o_ref.dtype)

    return kernel


def bad_transformer_block_head(x, params, *, tm=1024, out_dtype=None,
                               matmul_dtype=jnp.bfloat16):
    """x: (B, N) float32.  Returns (B, N, E) in out_dtype (default float32)."""
    B, N = x.shape
    M = B * N
    E = int(params["w1"].shape[0])

    out_dtype = jnp.dtype(out_dtype) if out_dtype is not None else jnp.dtype(jnp.float32)
    mm_dtype = jnp.dtype(matmul_dtype)
    f32_parity = (mm_dtype == jnp.dtype(jnp.float32))

    is_v7, has_bf16_vpu, vmem_cap = _chip_info()

    # bf16 epilogue only where the VPU supports it (v6e/v7x); f32 otherwise,
    # and always f32 for the f32-parity matmul variant.
    if f32_parity or not has_bf16_vpu:
        ep_dtype = jnp.dtype(jnp.float32)
    else:
        ep_dtype = jnp.dtype(jnp.bfloat16)

    # Lane-dense feature dim: pad E up to a multiple of 128 (unmasked vst).
    E_pad = max(_round_up(E, 128), 128)

    ep_b, mm_b, out_b = ep_dtype.itemsize, mm_dtype.itemsize, out_dtype.itemsize

    # --- Row-tile selection -------------------------------------------------
    tm = max(8, min(int(tm), _round_up(M, 8)))
    tm = _round_up(tm, 8)

    # VMEM budget: physical capacity minus ~20% headroom for compiler scratch.
    vmem_budget = (vmem_cap * 13) // 16
    while tm > 8 and _vmem_need(tm, E_pad, ep_b, mm_b, out_b) > vmem_budget:
        tm = max(8, _round_up(tm // 2, 8))

    # v7x has 2 TensorCores: make sure the 'parallel' grid axis has >= 2 steps.
    if is_v7 and M > 8:
        tm = min(tm, max(8, _round_up(pl.cdiv(M, 2), 8)))

    grid = (int(pl.cdiv(M, tm)),)

    need = _vmem_need(tm, E_pad, ep_b, mm_b, out_b)
    vmem_limit = int(min(vmem_budget, max(need + need // 2, 32 * 1024 * 1024)))

    # --- Parameter packing --------------------------------------------------
    def row(a, dt):
        a = jnp.asarray(a, jnp.float32).reshape(1, -1)
        a = jnp.pad(a, ((0, 0), (0, E_pad - a.shape[1])))
        return a.astype(dt)

    def mat(a):
        a = jnp.asarray(a, jnp.float32)
        a = jnp.pad(a, ((0, E_pad - E), (0, E_pad - E)))
        return a.astype(mm_dtype)

    # Weights stored as (in, out): kernel does h @ W + b  ==  torch x @ W.T + b.
    w0 = row(params["w0"], ep_dtype)
    b0 = row(params["b0"], ep_dtype)
    b1 = row(params["b1"], ep_dtype)
    b2 = row(params["b2"], ep_dtype)
    w1 = mat(params["w1"])
    w2 = mat(params["w2"])
    alphas = jnp.stack([params["a0"], params["a1"], params["a2"]]).astype(jnp.float32)

    x_flat = x.reshape(M, 1).astype(jnp.float32)   # no M padding: partial last block

    resident = pl.BlockSpec(memory_space=pltpu.MemorySpace.VMEM)   # whole array, 1 buffer

    cost = pl.CostEstimate(
        flops=4 * M * E_pad * E_pad + 10 * M * E_pad,
        transcendentals=0,
        bytes_accessed=(M * 4 + M * E_pad * out_b
                        + 2 * E_pad * E_pad * mm_b + 4 * E_pad * ep_b + 12))

    out = pl.pallas_call(
        _make_kernel(ep_dtype, mm_dtype, f32_parity),
        out_shape=jax.ShapeDtypeStruct((M, E_pad), out_dtype),
        grid=grid,
        in_specs=[
            pl.BlockSpec(memory_space=pltpu.MemorySpace.SMEM),     # alphas
            pl.BlockSpec((tm, 1), lambda i: (i, 0)),               # x rows (pipelined)
            resident,                                              # w0
            resident,                                              # b0
            resident,                                              # w1
            resident,                                              # b1
            resident,                                              # w2
            resident,                                              # b2
        ],
        out_specs=pl.BlockSpec((tm, E_pad), lambda i: (i, 0)),
        compiler_params=pltpu.CompilerParams(
            dimension_semantics=("parallel",),
            vmem_limit_bytes=vmem_limit),
        cost_estimate=cost,
    )(alphas, x_flat, w0, b0, w1, b1, w2, b2)

    if E_pad != E:
        out = out[:, :E]          # only pay the slice when E isn't lane-aligned
    return out.reshape(B, N, E)


def init_params(key, emb_dim):
    """Deterministic parameter init matching the torch module's shapes.

    torch Linear(in, out): weight (out, in), bias (out,).  We store weights
    transposed as (in, out) so the kernel can do `h @ W + b`.
    PReLU(): single scalar parameter, torch default init = 0.25.
    """
    k0, k1, k2, k3, k4, k5 = jax.random.split(key, 6)
    params = {
        "w0": jax.random.normal(k0, (1, emb_dim), jnp.float32) * 0.5,        # Linear(1, E)
        "b0": jax.random.normal(k1, (emb_dim,), jnp.float32) * 0.1,
        "w1": jax.random.normal(k2, (emb_dim, emb_dim), jnp.float32)
              * (1.0 / jnp.sqrt(emb_dim)),                                    # Linear(E, E)
        "b1": jax.random.normal(k3, (emb_dim,), jnp.float32) * 0.1,
        "w2": jax.random.normal(k4, (emb_dim, emb_dim), jnp.float32)
              * (1.0 / jnp.sqrt(emb_dim)),                                    # Linear(E, E)
        "b2": jax.random.normal(k5, (emb_dim,), jnp.float32) * 0.1,
        "a0": jnp.float32(0.25),
        "a1": jnp.float32(0.25),
        "a2": jnp.float32(0.25),
    }
    return params


def _reference(x, params):
    """Pure-JAX f32 reference of the torch forward pass, for validation."""
    B, N = x.shape
    h = x.reshape(B, N, 1).astype(jnp.float32)

    def prelu(v, a):
        return jnp.where(v >= 0, v, a * v)

    h = h * params["w0"].reshape(1, 1, -1) + params["b0"]
    h = prelu(h, params["a0"])
    h = jnp.einsum("bne,ef->bnf", h, params["w1"]) + params["b1"]
    h = prelu(h, params["a1"])
    h = jnp.einsum("bne,ef->bnf", h, params["w2"]) + params["b2"]
    h = prelu(h, params["a2"])
    return h


if __name__ == "__main__":
    B, N, E = 2, 8, 32   # batch=2, seq=8, emb_dim=32 (small-shape stand-in for 512)

    key = jax.random.PRNGKey(0)
    kx, kp = jax.random.split(key)
    x = jax.random.normal(kx, (B, N), jnp.float32)
    params = init_params(kp, E)

    ref = _reference(x, params)

    # Fast path: bf16 MXU inputs (bf16 epilogue on v6e/v7x, f32 epilogue on v5e).
    out = jax.block_until_ready(bad_transformer_block_head(x, params))
    assert out.shape == (B, N, E), out.shape
    assert jnp.allclose(out, ref, atol=1e-1, rtol=1e-1), \
        float(jnp.max(jnp.abs(out - ref)))

    # Numerical-parity path: f32 weights / f32 epilogue (reduced MXU rate).
    out32 = jax.block_until_ready(
        bad_transformer_block_head(x, params, matmul_dtype=jnp.float32))
    assert out32.shape == (B, N, E), out32.shape
    assert jnp.allclose(out32, ref, atol=2e-2, rtol=2e-2), \
        float(jnp.max(jnp.abs(out32 - ref)))

    print("KERNEL_OK")
</pallas_src>

<mosaic_0001>
module attributes {stable_mosaic.version = 11 : i64} {
  func.func @kernel(%arg0: i32, %arg1: memref<3xf32, #tpu.memory_space<smem>>, %arg2: memref<16x1xf32, #tpu.memory_space<vmem>>, %arg3: memref<1x128xf32, #tpu.memory_space<vmem>>, %arg4: memref<1x128xf32, #tpu.memory_space<vmem>>, %arg5: memref<128x128xbf16, #tpu.memory_space<vmem>>, %arg6: memref<1x128xf32, #tpu.memory_space<vmem>>, %arg7: memref<128x128xbf16, #tpu.memory_space<vmem>>, %arg8: memref<1x128xf32, #tpu.memory_space<vmem>>, %arg9: memref<16x128xf32, #tpu.memory_space<vmem>>) attributes {dimension_semantics = [#tpu.dimension_semantics<parallel>], iteration_bounds = array<i64: 1>, scalar_prefetch = 0 : i64, scratch_operands = 0 : i64, tpu.core_type = #tpu.core_type<tc>, window_params = [{transform_indices = @transform_0, window_bounds = array<i64: 3>}, {transform_indices = @transform_1, window_bounds = array<i64: 16, 1>}, {pipeline_mode = #tpu.pipeline_mode<synchronous>, transform_indices = @transform_2, window_bounds = array<i64: 1, 128>}, {pipeline_mode = #tpu.pipeline_mode<synchronous>, transform_indices = @transform_3, window_bounds = array<i64: 1, 128>}, {pipeline_mode = #tpu.pipeline_mode<synchronous>, transform_indices = @transform_4, window_bounds = array<i64: 128, 128>}, {pipeline_mode = #tpu.pipeline_mode<synchronous>, transform_indices = @transform_5, window_bounds = array<i64: 1, 128>}, {pipeline_mode = #tpu.pipeline_mode<synchronous>, transform_indices = @transform_6, window_bounds = array<i64: 128, 128>}, {pipeline_mode = #tpu.pipeline_mode<synchronous>, transform_indices = @transform_7, window_bounds = array<i64: 1, 128>}, {transform_indices = @transform_8, window_bounds = array<i64: 16, 128>}]} {
    %c0 = arith.constant 0 : index
    %0 = memref.load %arg1[%c0] : memref<3xf32, #tpu.memory_space<smem>>
    %c1 = arith.constant 1 : index
    %1 = memref.load %arg1[%c1] : memref<3xf32, #tpu.memory_space<smem>>
    %c2 = arith.constant 2 : index
    %2 = memref.load %arg1[%c2] : memref<3xf32, #tpu.memory_space<smem>>
    %c0_0 = arith.constant 0 : index
    %c0_1 = arith.constant 0 : index
    %3 = vector.load %arg2[%c0_0, %c0_1] : memref<16x1xf32, #tpu.memory_space<vmem>>, vector<16x1xf32>
    %c0_2 = arith.constant 0 : index
    %c0_3 = arith.constant 0 : index
    %4 = vector.load %arg3[%c0_2, %c0_3] : memref<1x128xf32, #tpu.memory_space<vmem>>, vector<1x128xf32>
    %5 = vector.broadcast %3 : vector<16x1xf32> to vector<16x128xf32>
    %6 = vector.broadcast %4 : vector<1x128xf32> to vector<16x128xf32>
    %7 = arith.mulf %5, %6 : vector<16x128xf32>
    %c0_4 = arith.constant 0 : index
    %c0_5 = arith.constant 0 : index
    %8 = vector.load %arg4[%c0_4, %c0_5] : memref<1x128xf32, #tpu.memory_space<vmem>>, vector<1x128xf32>
    %9 = vector.broadcast %8 : vector<1x128xf32> to vector<16x128xf32>
    %10 = arith.addf %7, %9 : vector<16x128xf32>
    %cst = arith.constant 0.000000e+00 : f32
    %11 = vector.broadcast %cst : f32 to vector<16x128xf32>
    %12 = arith.cmpf oge, %10, %11 : vector<16x128xf32>
    %13 = vector.broadcast %0 : f32 to vector<16x128xf32>
    %14 = arith.mulf %13, %10 : vector<16x128xf32>
    %15 = arith.select %12, %10, %14 : vector<16x128xi1>, vector<16x128xf32>
    %16 = arith.truncf %15 : vector<16x128xf32> to vector<16x128xbf16>
    %c0_6 = arith.constant 0 : index
    %c0_7 = arith.constant 0 : index
    %17 = vector.load %arg5[%c0_6, %c0_7] : memref<128x128xbf16, #tpu.memory_space<vmem>>, vector<128x128xbf16>
    %cst_8 = arith.constant dense<0.000000e+00> : vector<16x128xf32>
    %18 = tpu.matmul %16, %17, %cst_8 {dimension_numbers = #tpu.dot_dimension_numbers<[1], [0], [0], [1], [0, 0, 1, 1], [], []>} : vector<16x128xbf16>, vector<128x128xbf16>, vector<16x128xf32> -> vector<16x128xf32>
    %c0_9 = arith.constant 0 : index
    %c0_10 = arith.constant 0 : index
    %19 = vector.load %arg6[%c0_9, %c0_10] : memref<1x128xf32, #tpu.memory_space<vmem>>, vector<1x128xf32>
    %20 = vector.broadcast %19 : vector<1x128xf32> to vector<16x128xf32>
    %21 = arith.addf %18, %20 : vector<16x128xf32>
    %cst_11 = arith.constant 0.000000e+00 : f32
    %22 = vector.broadcast %cst_11 : f32 to vector<16x128xf32>
    %23 = arith.cmpf oge, %21, %22 : vector<16x128xf32>
    %24 = vector.broadcast %1 : f32 to vector<16x128xf32>
    %25 = arith.mulf %24, %21 : vector<16x128xf32>
    %26 = arith.select %23, %21, %25 : vector<16x128xi1>, vector<16x128xf32>
    %27 = arith.truncf %26 : vector<16x128xf32> to vector<16x128xbf16>
    %c0_12 = arith.constant 0 : index
    %c0_13 = arith.constant 0 : index
    %28 = vector.load %arg7[%c0_12, %c0_13] : memref<128x128xbf16, #tpu.memory_space<vmem>>, vector<128x128xbf16>
    %cst_14 = arith.constant dense<0.000000e+00> : vector<16x128xf32>
    %29 = tpu.matmul %27, %28, %cst_14 {dimension_numbers = #tpu.dot_dimension_numbers<[1], [0], [0], [1], [0, 0, 1, 1], [], []>} : vector<16x128xbf16>, vector<128x128xbf16>, vector<16x128xf32> -> vector<16x128xf32>
    %c0_15 = arith.constant 0 : index
    %c0_16 = arith.constant 0 : index
    %30 = vector.load %arg8[%c0_15, %c0_16] : memref<1x128xf32, #tpu.memory_space<vmem>>, vector<1x128xf32>
    %31 = vector.broadcast %30 : vector<1x128xf32> to vector<16x128xf32>
    %32 = arith.addf %29, %31 : vector<16x128xf32>
    %cst_17 = arith.constant 0.000000e+00 : f32
    %33 = vector.broadcast %cst_17 : f32 to vector<16x128xf32>
    %34 = arith.cmpf oge, %32, %33 : vector<16x128xf32>
    %35 = vector.broadcast %2 : f32 to vector<16x128xf32>
    %36 = arith.mulf %35, %32 : vector<16x128xf32>
    %37 = arith.select %34, %32, %36 : vector<16x128xi1>, vector<16x128xf32>
    %c0_18 = arith.constant 0 : index
    %c0_19 = arith.constant 0 : index
    %38 = vector.load %arg9[%c0_18, %c0_19] : memref<16x128xf32, #tpu.memory_space<vmem>>, vector<16x128xf32>
    tpu.vector_store %arg9[%c0_18, %c0_19], %37 {strides = array<i32>} : memref<16x128xf32, #tpu.memory_space<vmem>>, vector<16x128xf32>,
    return
  }
  func.func @transform_0(%arg0: i32) -> i32 {
    %c0_i32 = arith.constant 0 : i32
    %c0_i32_0 = arith.constant 0 : i32
    return %c0_i32 : i32
  }
  func.func @transform_1(%arg0: i32) -> (i32, i32) {
    %c0_i32 = arith.constant 0 : i32
    %c0_i32_0 = arith.constant 0 : i32
    return %arg0, %c0_i32 : i32, i32
  }
  func.func @transform_2(%arg0: i32) -> (i32, i32) {
    %c0_i32 = arith.constant 0 : i32
    %c0_i32_0 = arith.constant 0 : i32
    %c0_i32_1 = arith.constant 0 : i32
    return %c0_i32, %c0_i32_0 : i32, i32
  }
  func.func @transform_3(%arg0: i32) -> (i32, i32) {
    %c0_i32 = arith.constant 0 : i32
    %c0_i32_0 = arith.constant 0 : i32
    %c0_i32_1 = arith.constant 0 : i32
    return %c0_i32, %c0_i32_0 : i32, i32
  }
  func.func @transform_4(%arg0: i32) -> (i32, i32) {
    %c0_i32 = arith.constant 0 : i32
    %c0_i32_0 = arith.constant 0 : i32
    %c0_i32_1 = arith.constant 0 : i32
    return %c0_i32, %c0_i32_0 : i32, i32
  }
  func.func @transform_5(%arg0: i32) -> (i32, i32) {
    %c0_i32 = arith.constant 0 : i32
    %c0_i32_0 = arith.constant 0 : i32
    %c0_i32_1 = arith.constant 0 : i32
    return %c0_i32, %c0_i32_0 : i32, i32
  }
  func.func @transform_6(%arg0: i32) -> (i32, i32) {
    %c0_i32 = arith.constant 0 : i32
    %c0_i32_0 = arith.constant 0 : i32
    %c0_i32_1 = arith.constant 0 : i32
    return %c0_i32, %c0_i32_0 : i32, i32
  }
  func.func @transform_7(%arg0: i32) -> (i32, i32) {
    %c0_i32 = arith.constant 0 : i32
    %c0_i32_0 = arith.constant 0 : i32
    %c0_i32_1 = arith.constant 0 : i32
    return %c0_i32, %c0_i32_0 : i32, i32
  }
  func.func @transform_8(%arg0: i32) -> (i32, i32) {
    %c0_i32 = arith.constant 0 : i32
    %c0_i32_0 = arith.constant 0 : i32
    return %arg0, %c0_i32 : i32, i32
  }
}

</mosaic_0001>

<bundles_post_ra>
// kernel: tpu_custom_call.1
= control target key start
LH: loop header
LB: loop body
LE: loop exit
PB: predicated region body
PF: predicated region fallthrough
CT: control target
= control target key end

     0   :  { %13 = vsyncpa [#allocation5], 0  ;;  %s698_s0 = inlined_call_operand.vmem [shape: f32[3], index: 0, kind: input, shape index: {}]   ;;  %s699_s1 = inlined_call_operand.vmem [shape: f32[16,1], index: 1, kind: input, shape index: {}]   ;;  %s700_s2 = inlined_call_operand.vmem [shape: f32[1,128], index: 2, kind: input, shape index: {}]   ;;  %s701_s3 = inlined_call_operand.vmem [shape: f32[1,128], index: 3, kind: input, shape index: {}]   ;;  %s702_s4 = inlined_call_operand.hbm [shape: bf16[128,128], index: 4, kind: input, shape index: {}]   ;;  %s703_s5 = inlined_call_operand.vmem [shape: f32[1,128], index: 5, kind: input, shape index: {}]   ;;  %s704_s6 = inlined_call_operand.hbm [shape: bf16[128,128], index: 6, kind: input, shape index: {}]   ;;  %s705_s7 = inlined_call_operand.vmem [shape: f32[1,128], index: 7, kind: input, shape index: {}]   ;;  %s706_s8 = inlined_call_operand.hbm [shape: f32[16,128], index: 8, kind: output, shape index: {}]  }
   0x1   :  { %14 = vsyncpa [#allocation3], 0 }
   0x2   :  { %15 = vsyncpa [#allocation8], 0 }
   0x3   :  { %16 = vsyncpa [#allocation4], 0  ;;  %s23_s29 = sshll.u32 %s698_s0, 4  ;;  %s24_s29 = int_to_ptr.vmem [resolvable:$true] %s23_s29 }
   0x4   :  { %s481_s30 = scalar_lea.vmem %s24_s29, 16  ;;  %p486_p1 = scmp.lt.s32.totalorder %s24_s29, %s24_s29 }
   0x5   :  { %p482_p0 = scmp.ne.s32.totalorder %s24_s29, %s481_s30  ;;  %p487_p2 = scmp.lt.s32.totalorder %s481_s30, %s481_s30 }
   0x7   :  { %p488_p3 = por %p487_p2, %p486_p1 }
   0x9   :  { %p489_p4 = pnand %p488_p3, %p482_p0 }
   0xb   :  { %492 = shalt.err (!%p489_p4)
}
   0xc   :  { %s567_s9 = smov [#allocation2]   ;;  %s568_s10 = smov [#allocation6]  }
   0xd   :  { %26 = dma.vmem_to_smem %s24_s29, 16, %s567_s9, [#allocation5]  }
   0xe   :  { %s38_s11 = sshll.u32 %s568_s10, 4  ;;  %s493_s14 = scalar_lea.hbm %s702_s4, 1024  ;;  %s39_s11 = int_to_ptr.vmem [resolvable:$true] %s38_s11 }
   0xf   :  { %p494_p5 = scmp.ne.s32.totalorder %s702_s4, %s493_s14  ;;  %p497_p6 = scmp.lt.u32.totalorder %s493_s14, %s702_s4 }
  0x11   :  { %p499_p7 = pnand %p497_p6, %p494_p5 }
  0x13   :  { %502 = shalt.err (!%p499_p7)
}
  0x14   :  { %s503_s18 = scalar_lea.vmem %s39_s11, 1024  ;;  %p508_p9 = scmp.lt.s32.totalorder %s39_s11, %s39_s11 }
  0x15   :  { %p504_p8 = scmp.ne.s32.totalorder %s39_s11, %s503_s18  ;;  %p509_p10 = scmp.lt.s32.totalorder %s503_s18, %s503_s18 }
  0x17   :  { %p510_p11 = por %p509_p10, %p508_p9 }
  0x19   :  { %p511_p12 = pnand %p510_p11, %p504_p8 }
  0x1b   :  { %514 = shalt.err (!%p511_p12)
}
  0x1c   :  { %s569_s19 = smov 64   ;;  %s570_s20 = smov 4  }
  0x1d   :  { %44 = dma.hbm_to_vmem [thread:$0]  %s702_s4, 1024, %s39_s11, [#allocation3], %s569_s19, %s569_s19, %s570_s20  }
  0x1e   :  { %s571_s23 = smov [#allocation7]   ;;  %s515_s27 = scalar_lea.hbm %s704_s6, 1024 }
  0x1f   :  { %s52_s24 = sshll.u32 %s571_s23, 4  ;;  %p516_p13 = scmp.ne.s32.totalorder %s704_s6, %s515_s27  ;;  %s53_s24 = int_to_ptr.vmem [resolvable:$true] %s52_s24 }
  0x20   :  { %p519_p0 = scmp.lt.u32.totalorder %s515_s27, %s704_s6 }
  0x22   :  { %p521_p1 = pnand %p519_p0, %p516_p13 }
  0x24   :  { %524 = shalt.err (!%p521_p1)
}
  0x25   :  { %s525_s10 = scalar_lea.vmem %s53_s24, 1024  ;;  %p530_p3 = scmp.lt.s32.totalorder %s53_s24, %s53_s24 }
  0x26   :  { %p526_p2 = scmp.ne.s32.totalorder %s53_s24, %s525_s10  ;;  %p531_p4 = scmp.lt.s32.totalorder %s525_s10, %s525_s10 }
  0x28   :  { %p532_p5 = por %p531_p4, %p530_p3 }
  0x2a   :  { %p533_p6 = pnand %p532_p5, %p526_p2 }
  0x2c   :  { %536 = shalt.err (!%p533_p6)
}
  0x2d   :  { %58 = dma.hbm_to_vmem [thread:$0]  %s704_s6, 1024, %s53_s24, [#allocation8], %s569_s19, %s569_s19, %s570_s20  }
  0x2e   :  { %559 = dma.done.wait [#allocation5], 16  }
  0x2f   :  { %560 = vsyncadd [#allocation5], 4294967280 }
  0x30   :  { %561 = dma.done.wait [#allocation3], 1024  }
  0x31   :  { %562 = vsyncadd [#allocation3], 4294966272 }
  0x32   :  { %563 = dma.done.wait [#allocation8], 1024  }
  0x33   :  { %564 = vsyncadd [#allocation8], 4294966272 }
  0x34   :  { %70 = sfence }
  0x35   :  { %v75_v0 = vld [vmem:[%s699_s1] sm:$0xff]  ;;  %v572_v1 = vmov 0   ;;  %v573_v2 = vmov 0.0   ;;  %v76_v4 = vld [vmem:[%s699_s1 + $0x8] sm:$0xff]  ;;  %v467_v6 = vld [vmem:[#allocation6 + $0x10] sm:$0xff]   ;;  %vm574_vm0 = vmmov 0  }
  0x36   :  { %464 = vset.pattern.permute.xlu0 %v572_v1  ;;  %413 = vmatprep.subr.bf16.mxu0 %v573_v2  ;;  %v465_v3 = vld [vmem:[#allocation6] sm:$0xff]   ;;  %v466_v5 = vld [vmem:[#allocation6 + $0x8] sm:$0xff]   ;;  %v468_v7 = vld [vmem:[#allocation6 + $0x18] sm:$0xff]   ;;  %s72_s1 = sld [smem:[#allocation2]]  ;;  %s374_s19 = sld [smem:[#allocation2 + $0x2]] }
  0x37   :  { %80 = vperm.xlu0 %464, %v75_v0   ;;  %433 = vmatprep.subr.bf16.mxu1 %v573_v2  ;;  %v469_v8 = vld [vmem:[#allocation6 + $0x20] sm:$0xff]   ;;  %v474_v10 = vld [vmem:[#allocation7 + $0x8] sm:$0xff]   ;;  %v475_v12 = vld [vmem:[#allocation7 + $0x10] sm:$0xff]  }
  0x38   :  { %414 = vmatpush3.bf16.msra.mxu0 %v465_v3  ;;  %429 = vmatprep.mubr.msk.bf16.mxu0 %vm574_vm0, %v573_v2  ;;  %v473_v9 = vld [vmem:[#allocation7] sm:$0xff]   ;;  %v470_v11 = vld [vmem:[#allocation6 + $0x28] sm:$0xff]   ;;  %v471_v13 = vld [vmem:[#allocation6 + $0x30] sm:$0xff]  }
  0x39   :  { %415 = vmatprep.subr.bf16.mxu0 %v573_v2  ;;  %449 = vmatprep.mubr.msk.bf16.mxu1 %vm574_vm0, %v573_v2  ;;  %v476_v14 = vld [vmem:[#allocation7 + $0x18] sm:$0xff]   ;;  %v477_v16 = vld [vmem:[#allocation7 + $0x20] sm:$0xff]   ;;  %v478_v17 = vld [vmem:[#allocation7 + $0x28] sm:$0xff]  }
  0x3a   :  { %434 = vmatpush3.bf16.msra.mxu1 %v473_v9  ;;  %v472_v15 = vld [vmem:[#allocation6 + $0x38] sm:$0xff]   ;;  %v375_v18 = vld [vmem:[%s700_s2] ss:$0 sm:$0xff]  ;;  %v479_v32 = vld [vmem:[#allocation7 + $0x30] sm:$0xff]   ;;  %s373_s2 = sld [smem:[#allocation2 + $0x1]] }
  0x3b   :  { %85 = vperm.xlu0 %464, %v76_v4   ;;  %435 = vmatprep.subr.bf16.mxu1 %v573_v2  ;;  %v376_v19 = vld [vmem:[%s701_s3] ss:$0 sm:$0xff]  ;;  %v480_v33 = vld [vmem:[#allocation7 + $0x38] sm:$0xff]  }
  0x3c   :  { %416 = vmatpush3.bf16.msra.mxu0 %v466_v5  ;;  %v107_v23 = vstv %s72_s1  ;;  %v377_v34 = vld [vmem:[%s703_s5] ss:$0 sm:$0xff]  ;;  %v347_v49 = vstv %s374_s19  ;;  %s575_s5 = smov [#allocation9]  }
  0x3d   :  { %417 = vmatprep.subr.bf16.mxu0 %v573_v2  ;;  %v386_v47 = vld [vmem:[%s705_s7] ss:$0 sm:$0xff]  ;;  %s359_s22 = sshll.u32 %s575_s5, 4  ;;  %s360_s22 = int_to_ptr.vmem [resolvable:$true] %s359_s22 }
  0x3e   :  { %436 = vmatpush3.bf16.msra.mxu1 %v474_v10  ;;  %s537_s23 = scalar_lea.vmem %s360_s22, 256  ;;  %p542_p8 = scmp.lt.s32.totalorder %s360_s22, %s360_s22 }
  0x3f   :  { %437 = vmatprep.subr.bf16.mxu1 %v573_v2  ;;  %p538_p7 = scmp.ne.s32.totalorder %s360_s22, %s537_s23  ;;  %p543_p9 = scmp.lt.s32.totalorder %s537_s23, %s537_s23 }
  0x40   :  { %418 = vmatpush3.bf16.msra.mxu0 %v467_v6  ;;  %v227_v36 = vstv %s373_s2 }
  0x41   :  { %419 = vmatprep.subr.bf16.mxu0 %v573_v2  ;;  %p544_p10 = por %p543_p9, %p542_p8 }
  0x42   :  { %438 = vmatpush3.bf16.msra.mxu1 %v475_v12 }
  0x43   :  { %439 = vmatprep.subr.bf16.mxu1 %v573_v2  ;;  %p545_p11 = pnand %p544_p10, %p538_p7 }
  0x44   :  { %420 = vmatpush3.bf16.msra.mxu0 %v468_v7 }
  0x45   :  { %421 = vmatprep.subr.bf16.mxu0 %v573_v2 }
  0x46   :  { %440 = vmatpush3.bf16.msra.mxu1 %v476_v14 }
  0x47   :  { %441 = vmatprep.subr.bf16.mxu1 %v573_v2 }
  0x48   :  { %422 = vmatpush3.bf16.msra.mxu0 %v469_v8 }
  0x49   :  { %423 = vmatprep.subr.bf16.mxu0 %v573_v2 }
  0x4a   :  { %442 = vmatpush3.bf16.msra.mxu1 %v477_v16 }
  0x4b   :  { %443 = vmatprep.subr.bf16.mxu1 %v573_v2 }
  0x4c   :  { %424 = vmatpush3.bf16.msra.mxu0 %v470_v11 }
  0x4d   :  { %425 = vmatprep.subr.bf16.mxu0 %v573_v2 }
  0x4e   :  { %444 = vmatpush3.bf16.msra.mxu1 %v478_v17 }
  0x4f   :  { %445 = vmatprep.subr.bf16.mxu1 %v573_v2 }
  0x50   :  { %426 = vmatpush3.bf16.msra.mxu0 %v471_v13 }
  0x51   :  { %427 = vmatprep.subr.bf16.mxu0 %v573_v2 }
  0x52   :  { %446 = vmatpush3.bf16.msra.mxu1 %v479_v32 }
  0x53   :  { %447 = vmatprep.subr.bf16.mxu1 %v573_v2 }
  0x54   :  { %428 = vmatpush3.bf16.msra.mxu0 %v472_v15 }
  0x56   :  { %448 = vmatpush3.bf16.msra.mxu1 %v480_v33 }
  0xb6   :  { %v81_v20 = vpop.permute.xlu0 %80 }
  0xb7   :  { %v94_v21 = vmul.f32 %v375_v18, %v81_v20 }
  0xb9   :  { %v103_v22 = vadd.f32 %v376_v19, %v94_v21 }
  0xba   :  { %v86_v24 = vpop.permute.xlu0 %85 }
  0xbb   :  { %v95_v25 = vmul.f32 %v375_v18, %v86_v24  ;;  %v108_v26 = vmul.f32 %v107_v23, %v103_v22  ;;  %vm105_vm1 = vcmp.ge.f32.partialorder %v103_v22, 0.0 }
  0xbd   :  { %v104_v27 = vadd.f32 %v376_v19, %v95_v25  ;;  %v110_v29 = vsel %vm105_vm1, %v103_v22, %v108_v26 }
  0xbf   :  { %vm106_vm2 = vcmp.ge.f32.partialorder %v104_v27, 0.0  ;;  %v109_v28 = vmul.f32 %v107_v23, %v104_v27 }
  0xc1   :  { %v111_v30 = vsel %vm106_vm2, %v104_v27, %v109_v28 }
  0xc2   :  { %v112_v31 = vpack.c.bf16 %v111_v30, %v110_v29 }
  0xc4   :  { %430 = vmatmul.mubr.bf16.vlgmr.msra.gmra.mrb[0].mxu0 %v112_v31 }
 0x197   :  { %v218_v35 = vpop.f32.mrb[0].mxu0 }
 0x198   :  { %v219_v37 = vadd.f32 %v377_v34, %v218_v35  ;;  %v431_v38 = vpop.f32.mrb[1].mxu0 }
 0x199   :  { %v221_v39 = vpop.f32.mrb[2].mxu0 }
 0x19a   :  { %v228_v40 = vmul.f32 %v227_v36, %v219_v37  ;;  %v222_v41 = vadd.f32 %v377_v34, %v221_v39  ;;  %v432_v42 = vpop.f32.mrb[3].mxu0  ;;  %vm225_vm3 = vcmp.ge.f32.partialorder %v219_v37, 0.0 }
 0x19c   :  { %vm226_vm4 = vcmp.ge.f32.partialorder %v222_v41, 0.0  ;;  %v229_v43 = vmul.f32 %v227_v36, %v222_v41  ;;  %v230_v44 = vsel %vm225_vm3, %v219_v37, %v228_v40 }
 0x19e   :  { %v231_v45 = vsel %vm226_vm4, %v222_v41, %v229_v43 }
 0x19f   :  { %v232_v46 = vpack.c.bf16 %v231_v45, %v230_v44 }
 0x1a1   :  { %450 = vmatmul.mubr.bf16.vlgmr.msra.gmra.mrb[0].mxu1 %v232_v46 }
 0x274   :  { %v338_v48 = vpop.f32.mrb[0].mxu1 }
 0x275   :  { %v339_v50 = vadd.f32 %v386_v47, %v338_v48  ;;  %v451_v51 = vpop.f32.mrb[1].mxu1 }
 0x276   :  { %v341_v52 = vpop.f32.mrb[2].mxu1 }
 0x277   :  { %vm345_vm5 = vcmp.ge.f32.partialorder %v339_v50, 0.0  ;;  %v348_v53 = vmul.f32 %v347_v49, %v339_v50  ;;  %v342_v54 = vadd.f32 %v386_v47, %v341_v52  ;;  %v452_v55 = vpop.f32.mrb[3].mxu1 }
 0x279   :  { %v350_v56 = vsel %vm345_vm5, %v339_v50, %v348_v53  ;;  %vm346_vm6 = vcmp.ge.f32.partialorder %v342_v54, 0.0  ;;  %v349_v57 = vmul.f32 %v347_v49, %v342_v54 }
 0x27a   :  { %352 = vst [vmem:[#allocation9] sm:$0xff] %v350_v56 }
 0x27b   :  { %v351_v58 = vsel %vm346_vm6, %v342_v54, %v349_v57 }
 0x27c   :  { %353 = vst [vmem:[#allocation9 + $0x8] sm:$0xff] %v351_v58 }
 0x27d   :  { %548 = shalt.err (!%p545_p11)
}
 0x27e   :  { %s549_s25 = scalar_lea.hbm %s706_s8, 256 }
 0x27f   :  { %p550_p12 = scmp.ne.s32.totalorder %s706_s8, %s549_s25  ;;  %p553_p13 = scmp.lt.u32.totalorder %s549_s25, %s706_s8 }
 0x281   :  { %p555_p0 = pnand %p553_p13, %p550_p12 }
 0x283   :  { %558 = shalt.err (!%p555_p0)
}
 0x284   :  { %s576_s30 = smov 128   ;;  %s577_s9 = smov 8  }
 0x285   :  { %365 = dma.vmem_to_hbm [thread:$0]  %s360_s22, 256, %s706_s8, [#allocation4], %s576_s30, %s576_s30, %s577_s9  }
 0x286   :  { %565 = dma.done.wait [#allocation4], 256  }
 0x287   :  { %566 = vsyncadd [#allocation4], 4294967040 }
 0x288   :  { %369 = vsyncpa [#allocation3], 1 }
 0x289   :  { %370 = vsyncpa [#allocation8], 1 }
 0x28a   :  { %371 = vsyncpa [#allocation4], 1 }
 0x28b   :  { %372 = vsyncpa [#allocation5], 1 }

</bundles_post_ra>
